<compile_context>
chip_gen: v7x
topology: tpu7x:2x2x1
jax: 0.10.0
libtpu: 0.0.40
codegen_flags: <defaults>
</compile_context>

<pallas_src>
import functools
import math

import jax
import jax.numpy as jnp
import numpy as np
from jax import lax
from jax.experimental import pallas as pl
from jax.experimental.pallas import tpu as pltpu


def _round_up(x, m):
    return (x + m - 1) // m * m


def _pick_tile(dim, max_tile, align):
    """Choose (block_size, padded_dim).  Prefers choices that need no padding."""
    if dim <= max_tile:
        return dim, dim                       # single full-extent block
    if dim % max_tile == 0:
        return max_tile, dim
    t = max_tile - align                      # aligned tile dividing dim exactly
    while t >= max(align, max_tile // 2):
        if dim % t == 0:
            return t, dim
        t -= align
    return max_tile, _round_up(dim, max_tile)  # fallback: pad


# ---------------------------------------------------------------------------
# Tiled linear projection kernel (no bias): out = x @ w
# ---------------------------------------------------------------------------
def _matmul_kernel(x_ref, w_ref, o_ref, acc_ref):
    @pl.when(pl.program_id(2) == 0)
    def _():
        acc_ref[...] = jnp.zeros_like(acc_ref)

    acc_ref[...] += jnp.dot(
        x_ref[...], w_ref[...], preferred_element_type=jnp.float32
    )

    @pl.when(pl.program_id(2) == pl.num_programs(2) - 1)
    def _():
        o_ref[...] = acc_ref[...].astype(o_ref.dtype)


def linear(x, w, *, tm=512, tn=512, tk=512):
    """x: (M, K) f32, w: (K, N) f32 -> (M, N) f32, tiled pipelined MXU matmul."""
    M, K = x.shape
    K2, N = w.shape
    assert K == K2

    bm, Mp = _pick_tile(M, tm, 8)
    bk, Kp = _pick_tile(K, tk, 128)
    bn, Np = _pick_tile(N, tn, 128)

    if (Mp, Kp) != (M, K):
        x = jnp.pad(x, ((0, Mp - M), (0, Kp - K)))
    if (Kp, Np) != (K, N):
        w = jnp.pad(w, ((0, Kp - K), (0, Np - N)))

    grid = (Mp // bm, Np // bn, Kp // bk)

    out = pl.pallas_call(
        _matmul_kernel,
        out_shape=jax.ShapeDtypeStruct((Mp, Np), jnp.float32),
        grid_spec=pltpu.PrefetchScalarGridSpec(
            num_scalar_prefetch=0,
            grid=grid,
            in_specs=[
                pl.BlockSpec((bm, bk), lambda i, j, k: (i, k)),
                pl.BlockSpec((bk, bn), lambda i, j, k: (k, j)),
            ],
            out_specs=pl.BlockSpec((bm, bn), lambda i, j, k: (i, j)),
            scratch_shapes=[pltpu.VMEM((bm, bn), jnp.float32)],
        ),
        compiler_params=pltpu.CompilerParams(
            dimension_semantics=("parallel", "parallel", "arbitrary"),
        ),
    )(x, w)

    if (Mp, Np) != (M, N):
        out = out[:M, :N]
    return out


# ---------------------------------------------------------------------------
# Fused multi-head attention + output projection (flash-style online softmax).
#   grid = (B, Tq tiles, Tk tiles); all heads of one batch per grid step.
#   q block: (1, tq, H*Dh)   k/v blocks: (1, tk, H*Dh)   W_o: (H*Dh, n_out_p)
#   out block: (1, tq, n_out_p)  -- lane-dense, already (B, Tq, num_hiddens).
#   valid_lens (per batch, int32) is scalar-prefetched to SMEM.
#   Scratch: m/l (tq, H) running max/sum, acc (tq, H*Dh) unnormalized output.
# ---------------------------------------------------------------------------
def _attention_kernel(vl_ref, q_ref, k_ref, v_ref, wo_ref, o_ref,
                      m_sc, l_sc, acc_sc, *, num_heads, d_head):
    b = pl.program_id(0)
    kv = pl.program_id(2)
    valid = vl_ref[b]

    @pl.when(kv == 0)
    def _():
        m_sc[...] = jnp.full_like(m_sc, -jnp.inf)
        l_sc[...] = jnp.zeros_like(l_sc)
        acc_sc[...] = jnp.zeros_like(acc_sc)

    scale = jnp.float32(1.0 / math.sqrt(d_head))
    qb = q_ref[0] * scale          # (tq, H*Dh) -- scale folded into Q once
    kb = k_ref[0]                  # (tk, H*Dh)
    vb = v_ref[0]                  # (tk, H*Dh)

    tq = qb.shape[0]
    tk = kb.shape[0]

    # key positions >= valid_len (and Tk padding) get -1e6, as in PyTorch ref
    col = kv * tk + lax.broadcasted_iota(jnp.int32, (tq, tk), 1)
    keep = col < valid

    m_prev = m_sc[...]             # (tq, H)
    l_prev = l_sc[...]             # (tq, H)

    m_list, l_list, corr_list, pv_list = [], [], [], []
    for h in range(num_heads):     # static, small loop over heads
        lo = h * d_head
        hi = lo + d_head
        q = qb[:, lo:hi]           # (tq, Dh) static lane slice
        k = kb[:, lo:hi]
        v = vb[:, lo:hi]

        s = lax.dot_general(q, k, (((1,), (1,)), ((), ())),
                            preferred_element_type=jnp.float32)    # (tq, tk)
        s = jnp.where(keep, s, jnp.float32(-1000000.0))

        m_old = m_prev[:, h:h + 1]                                 # (tq, 1)
        m_new = jnp.maximum(m_old, jnp.max(s, axis=-1, keepdims=True))
        a = jnp.exp(m_old - m_new)                                 # (tq, 1)
        e = jnp.exp(s - m_new)                                     # (tq, tk)
        l_new = a * l_prev[:, h:h + 1] + jnp.sum(e, axis=-1, keepdims=True)

        # un-normalized PV; normalization deferred to the epilogue
        pv_list.append(jnp.dot(e, v, preferred_element_type=jnp.float32))
        corr_list.append(jnp.broadcast_to(a, (tq, d_head)))
        m_list.append(m_new)
        l_list.append(l_new)

    m_sc[...] = jnp.concatenate(m_list, axis=-1)                   # (tq, H)
    l_sc[...] = jnp.concatenate(l_list, axis=-1)                   # (tq, H)
    corr = jnp.concatenate(corr_list, axis=-1)                     # (tq, H*Dh)
    pv = jnp.concatenate(pv_list, axis=-1)                         # (tq, H*Dh)
    acc_sc[...] = corr * acc_sc[...] + pv

    @pl.when(kv == pl.num_programs(2) - 1)
    def _():
        # exact reciprocal (approx=True would exceed the 1e-4 tolerance)
        inv = pl.reciprocal(l_sc[...])                             # (tq, H)
        inv_full = jnp.concatenate(
            [jnp.broadcast_to(inv[:, h:h + 1], (tq, d_head))
             for h in range(num_heads)], axis=-1)                  # (tq, H*Dh)
        out_cat = acc_sc[...] * inv_full
        # single output projection, contraction K = H*Dh (full MXU fill)
        o_ref[0] = jnp.dot(out_cat, wo_ref[...],
                           preferred_element_type=jnp.float32
                           ).astype(o_ref.dtype)


def attention_with_output_proj(q, k, v, w_o, valid_lens, num_heads,
                               *, tq_max=128, tk_max=512):
    """q: (B, Tq, H*Dh), k/v: (B, Tk, H*Dh), w_o: (H*Dh, n_out) -> (B, Tq, n_out)."""
    B, Tq, HD = q.shape
    _, Tk, _ = k.shape
    d_head = HD // num_heads
    n_out = w_o.shape[1]

    tq, Tq_p = _pick_tile(Tq, tq_max, 8)
    tk, Tk_p = _pick_tile(Tk, tk_max, 8)

    if Tq_p != Tq:
        q = jnp.pad(q, ((0, 0), (0, Tq_p - Tq), (0, 0)))
    if Tk_p != Tk:
        k = jnp.pad(k, ((0, 0), (0, Tk_p - Tk), (0, 0)))
        v = jnp.pad(v, ((0, 0), (0, Tk_p - Tk), (0, 0)))

    # Lane-dense output: pad W_o columns to a multiple of 128 (no-op for
    # typical num_hiddens) so the kernel's output store is an unmasked vst.
    n_out_p = _round_up(n_out, 128)
    if n_out_p != n_out:
        w_o = jnp.pad(w_o, ((0, 0), (0, n_out_p - n_out)))

    if valid_lens is None:
        vl = jnp.full((B,), Tk, dtype=jnp.int32)   # original Tk masks padding
    else:
        vl = valid_lens.astype(jnp.int32)

    kernel = functools.partial(
        _attention_kernel, num_heads=num_heads, d_head=d_head)

    out = pl.pallas_call(
        kernel,
        out_shape=jax.ShapeDtypeStruct((B, Tq_p, n_out_p), jnp.float32),
        grid_spec=pltpu.PrefetchScalarGridSpec(
            num_scalar_prefetch=1,
            grid=(B, Tq_p // tq, Tk_p // tk),
            in_specs=[
                pl.BlockSpec((1, tq, HD), lambda b, qi, kv, vl_ref: (b, qi, 0)),
                pl.BlockSpec((1, tk, HD), lambda b, qi, kv, vl_ref: (b, kv, 0)),
                pl.BlockSpec((1, tk, HD), lambda b, qi, kv, vl_ref: (b, kv, 0)),
                pl.BlockSpec((HD, n_out_p), lambda b, qi, kv, vl_ref: (0, 0)),
            ],
            out_specs=pl.BlockSpec((1, tq, n_out_p),
                                   lambda b, qi, kv, vl_ref: (b, qi, 0)),
            scratch_shapes=[
                pltpu.VMEM((tq, num_heads), jnp.float32),   # running max m
                pltpu.VMEM((tq, num_heads), jnp.float32),   # running sum l
                pltpu.VMEM((tq, HD), jnp.float32),          # unnormalized acc
            ],
        ),
        compiler_params=pltpu.CompilerParams(
            dimension_semantics=("parallel", "parallel", "arbitrary"),
        ),
    )(vl, q, k, v, w_o)

    if Tq_p != Tq or n_out_p != n_out:
        out = out[:, :Tq, :n_out]
    return out


# ---------------------------------------------------------------------------
# Full MultiHeadAttention forward
# ---------------------------------------------------------------------------
def multi_head_attention(params, queries, keys, values, valid_lens, num_heads,
                         self_attention=False):
    B, Tq, Dq = queries.shape
    _, Tk, Dk = keys.shape
    Dv = values.shape[-1]
    H = params["W_q"].shape[1]  # num_hiddens

    if self_attention:
        # Fused QKV projection: one matmul with [Wq | Wk | Wv].  W_qkv should
        # be precomputed once in params (hoisted out of the forward pass).
        w_qkv = params.get("W_qkv")
        if w_qkv is None:
            w_qkv = jnp.concatenate(
                [params["W_q"], params["W_k"], params["W_v"]], axis=1)
        qkv = linear(queries.reshape(B * Tq, Dq), w_qkv).reshape(B, Tq, 3 * H)
        q = qkv[..., :H]
        k = qkv[..., H:2 * H]
        v = qkv[..., 2 * H:]
    else:
        q = linear(queries.reshape(B * Tq, Dq), params["W_q"]).reshape(B, Tq, H)
        k = linear(keys.reshape(B * Tk, Dk), params["W_k"]).reshape(B, Tk, H)
        v = linear(values.reshape(B * Tv_or(Tk), Dv), params["W_v"]).reshape(B, Tk, H) if False else \
            linear(values.reshape(B * Tk, Dv), params["W_v"]).reshape(B, Tk, H)

    # Heads are split inside the attention kernel (lane slices of H = heads*Dh),
    # so no transpose_qkv / transpose_output HBM round trips are needed.
    return attention_with_output_proj(q, k, v, params["W_o"], valid_lens,
                                      num_heads)


def Tv_or(tk):  # never called; keeps the expression above statically valid
    return tk


# ---------------------------------------------------------------------------
# Pure-JAX reference (mirrors the PyTorch module exactly) for verification.
# ---------------------------------------------------------------------------
def _split_heads(x, num_heads):
    B, T, D = x.shape
    x = x.reshape(B, T, num_heads, D // num_heads)
    x = jnp.transpose(x, (0, 2, 1, 3))
    return x.reshape(B * num_heads, T, D // num_heads)


def _merge_heads(x, num_heads):
    BH, T, Dh = x.shape
    B = BH // num_heads
    x = x.reshape(B, num_heads, T, Dh)
    x = jnp.transpose(x, (0, 2, 1, 3))
    return x.reshape(B, T, num_heads * Dh)


def reference_mha(params, queries, keys, values, valid_lens, num_heads):
    q = _split_heads(queries @ params["W_q"], num_heads)
    k = _split_heads(keys @ params["W_k"], num_heads)
    v = _split_heads(values @ params["W_v"], num_heads)
    d = q.shape[-1]
    scores = jnp.einsum("bqd,bkd->bqk", q, k) / math.sqrt(d)
    if valid_lens is not None:
        vl = jnp.repeat(valid_lens.astype(jnp.int32), num_heads, axis=0)
        col = jnp.arange(scores.shape[-1], dtype=jnp.int32)[None, None, :]
        scores = jnp.where(col < vl[:, None, None], scores, -1000000.0)
    w = jax.nn.softmax(scores, axis=-1)
    out = jnp.einsum("bqk,bkd->bqd", w, v)
    return _merge_heads(out, num_heads) @ params["W_o"]


if __name__ == "__main__":
    B = 2
    Tq = 8
    Tk = 8
    query_size = key_size = value_size = 16
    num_hiddens = 32
    num_heads = 4

    key = jax.random.PRNGKey(0)
    k0, k1, k2, k3, k4, k5, k6 = jax.random.split(key, 7)

    def init_w(kk, fan_in, fan_out):
        bound = 1.0 / math.sqrt(fan_in)
        return jax.random.uniform(kk, (fan_in, fan_out), jnp.float32,
                                  -bound, bound)

    params = {
        "W_q": init_w(k0, query_size, num_hiddens),
        "W_k": init_w(k1, key_size, num_hiddens),
        "W_v": init_w(k2, value_size, num_hiddens),
        "W_o": init_w(k3, num_hiddens, num_hiddens),
    }
    # Hoisted once (not per forward call): fused QKV weight for self-attention.
    params["W_qkv"] = jnp.concatenate(
        [params["W_q"], params["W_k"], params["W_v"]], axis=1)

    queries = jax.random.normal(k4, (B, Tq, query_size), jnp.float32)
    keys = jax.random.normal(k5, (B, Tk, key_size), jnp.float32)
    values = jax.random.normal(k6, (B, Tk, value_size), jnp.float32)
    valid_lens = jnp.array([3, 6], dtype=jnp.int32)  # per-batch valid key lens

    # 1) cross-attention (distinct q/k/v), masked
    out = multi_head_attention(params, queries, keys, values, valid_lens,
                               num_heads)
    out = jax.block_until_ready(out)
    ref = reference_mha(params, queries, keys, values, valid_lens, num_heads)
    np.testing.assert_allclose(np.asarray(out), np.asarray(ref),
                               atol=1e-4, rtol=1e-4)

    # 2) self-attention path (fused QKV projection), masked
    out_sa = multi_head_attention(params, queries, queries, queries,
                                  valid_lens, num_heads, self_attention=True)
    out_sa = jax.block_until_ready(out_sa)
    ref_sa = reference_mha(params, queries, queries, queries, valid_lens,
                           num_heads)
    np.testing.assert_allclose(np.asarray(out_sa), np.asarray(ref_sa),
                               atol=1e-4, rtol=1e-4)

    # 3) no mask (valid_lens=None)
    out_nm = multi_head_attention(params, queries, keys, values, None,
                                  num_heads)
    out_nm = jax.block_until_ready(out_nm)
    ref_nm = reference_mha(params, queries, keys, values, None, num_heads)
    np.testing.assert_allclose(np.asarray(out_nm), np.asarray(ref_nm),
                               atol=1e-4, rtol=1e-4)

    print("KERNEL_OK")
</pallas_src>

<mosaic_0001>
module attributes {stable_mosaic.version = 11 : i64} {
  func.func @_matmul_kernel(%arg0: i32, %arg1: i32, %arg2: i32, %arg3: memref<16x16xf32, #tpu.memory_space<vmem>>, %arg4: memref<16x32xf32, #tpu.memory_space<vmem>>, %arg5: memref<16x32xf32, #tpu.memory_space<vmem>>, %arg6: memref<16x32xf32, #tpu.memory_space<vmem>>) attributes {dimension_semantics = [#tpu.dimension_semantics<parallel>, #tpu.dimension_semantics<parallel>, #tpu.dimension_semantics<arbitrary>], iteration_bounds = array<i64: 1, 1, 1>, scalar_prefetch = 0 : i64, scratch_operands = 1 : i64, tpu.core_type = #tpu.core_type<tc>, window_params = [{transform_indices = @transform_0, window_bounds = array<i64: 16, 16>}, {transform_indices = @transform_1, window_bounds = array<i64: 16, 32>}, {transform_indices = @transform_2, window_bounds = array<i64: 16, 32>}]} {
    %c0_i32 = arith.constant 0 : i32
    %0 = arith.cmpi eq, %arg2, %c0_i32 : i32
    %1 = arith.extui %0 : i1 to i32
    %c0_i32_0 = arith.constant 0 : i32
    %2 = arith.cmpi ne, %1, %c0_i32_0 : i32
    scf.if %2 {
      %cst_10 = arith.constant 0.000000e+00 : f32
      %12 = vector.broadcast %cst_10 : f32 to vector<16x32xf32>
      %c0_11 = arith.constant 0 : index
      %c0_12 = arith.constant 0 : index
      %13 = vector.load %arg6[%c0_11, %c0_12] : memref<16x32xf32, #tpu.memory_space<vmem>>, vector<16x32xf32>
      tpu.vector_store %arg6[%c0_11, %c0_12], %12 {strides = array<i32>} : memref<16x32xf32, #tpu.memory_space<vmem>>, vector<16x32xf32>,
    } else {
    }
    %c0 = arith.constant 0 : index
    %c0_1 = arith.constant 0 : index
    %3 = vector.load %arg6[%c0, %c0_1] : memref<16x32xf32, #tpu.memory_space<vmem>>, vector<16x32xf32>
    %c0_2 = arith.constant 0 : index
    %c0_3 = arith.constant 0 : index
    %4 = vector.load %arg3[%c0_2, %c0_3] : memref<16x16xf32, #tpu.memory_space<vmem>>, vector<16x16xf32>
    %c0_4 = arith.constant 0 : index
    %c0_5 = arith.constant 0 : index
    %5 = vector.load %arg4[%c0_4, %c0_5] : memref<16x32xf32, #tpu.memory_space<vmem>>, vector<16x32xf32>
    %cst = arith.constant dense<0.000000e+00> : vector<16x32xf32>
    %6 = tpu.matmul %4, %5, %cst {dimension_numbers = #tpu.dot_dimension_numbers<[1], [0], [0], [1], [0, 0, 1, 1], [], []>} : vector<16x16xf32>, vector<16x32xf32>, vector<16x32xf32> -> vector<16x32xf32>
    %7 = arith.addf %3, %6 : vector<16x32xf32>
    %c0_6 = arith.constant 0 : index
    %c0_7 = arith.constant 0 : index
    %8 = vector.load %arg6[%c0_6, %c0_7] : memref<16x32xf32, #tpu.memory_space<vmem>>, vector<16x32xf32>
    tpu.vector_store %arg6[%c0_6, %c0_7], %7 {strides = array<i32>} : memref<16x32xf32, #tpu.memory_space<vmem>>, vector<16x32xf32>,
    %c0_i32_8 = arith.constant 0 : i32
    %9 = arith.cmpi eq, %arg2, %c0_i32_8 : i32
    %10 = arith.extui %9 : i1 to i32
    %c0_i32_9 = arith.constant 0 : i32
    %11 = arith.cmpi ne, %10, %c0_i32_9 : i32
    scf.if %11 {
      %c0_10 = arith.constant 0 : index
      %c0_11 = arith.constant 0 : index
      %12 = vector.load %arg6[%c0_10, %c0_11] : memref<16x32xf32, #tpu.memory_space<vmem>>, vector<16x32xf32>
      %c0_12 = arith.constant 0 : index
      %c0_13 = arith.constant 0 : index
      %13 = vector.load %arg5[%c0_12, %c0_13] : memref<16x32xf32, #tpu.memory_space<vmem>>, vector<16x32xf32>
      tpu.vector_store %arg5[%c0_12, %c0_13], %12 {strides = array<i32>} : memref<16x32xf32, #tpu.memory_space<vmem>>, vector<16x32xf32>,
    } else {
    }
    return
  }
  func.func @transform_0(%arg0: i32, %arg1: i32, %arg2: i32) -> (i32, i32) {
    %c0_i32 = arith.constant 0 : i32
    return %arg0, %arg2 : i32, i32
  }
  func.func @transform_1(%arg0: i32, %arg1: i32, %arg2: i32) -> (i32, i32) {
    %c0_i32 = arith.constant 0 : i32
    return %arg2, %arg1 : i32, i32
  }
  func.func @transform_2(%arg0: i32, %arg1: i32, %arg2: i32) -> (i32, i32) {
    %c0_i32 = arith.constant 0 : i32
    return %arg0, %arg1 : i32, i32
  }
}

</mosaic_0001>

<bundles_post_ra>
// kernel: tpu_custom_call.1
= control target key start
LH: loop header
LB: loop body
LE: loop exit
PB: predicated region body
PF: predicated region fallthrough
CT: control target
= control target key end

     0   :  { %7 = vsyncpa [#allocation4], 0  ;;  %s332_s0 = inlined_call_operand.hbm [shape: f32[16,16], index: 0, kind: input, shape index: {}]   ;;  %s333_s1 = inlined_call_operand.hbm [shape: f32[16,32], index: 1, kind: input, shape index: {}]   ;;  %s334_s2 = inlined_call_operand.hbm [shape: f32[16,32], index: 2, kind: output, shape index: {}]  }
   0x1   :  { %8 = vsyncpa [#allocation7], 0 }
   0x2   :  { %9 = vsyncpa [#allocation5], 0  ;;  %s260_s9 = smov [#allocation3]   ;;  %s188_s13 = scalar_lea.hbm %s332_s0, 256 }
   0x3   :  { %s15_s10 = sshll.u32 %s260_s9, 4  ;;  %p189_p0 = scmp.ne.s32.totalorder %s332_s0, %s188_s13  ;;  %s16_s10 = int_to_ptr.vmem [resolvable:$true] %s15_s10 }
   0x4   :  { %p192_p1 = scmp.lt.u32.totalorder %s188_s13, %s332_s0 }
   0x6   :  { %p194_p2 = pnand %p192_p1, %p189_p0 }
   0x8   :  { %197 = shalt.err (!%p194_p2)
}
   0x9   :  { %s198_s18 = scalar_lea.vmem %s16_s10, 256  ;;  %p203_p4 = scmp.lt.s32.totalorder %s16_s10, %s16_s10 }
   0xa   :  { %p199_p3 = scmp.ne.s32.totalorder %s16_s10, %s198_s18  ;;  %p204_p5 = scmp.lt.s32.totalorder %s198_s18, %s198_s18 }
   0xc   :  { %p205_p6 = por %p204_p5, %p203_p4 }
   0xe   :  { %p206_p7 = pnand %p205_p6, %p199_p3 }
  0x10   :  { %209 = shalt.err (!%p206_p7)
}
  0x11   :  { %s261_s19 = smov 128   ;;  %s262_s20 = smov 8  }
  0x12   :  { %21 = dma.hbm_to_vmem [thread:$0]  %s332_s0, 256, %s16_s10, [#allocation4], %s261_s19, %s261_s19, %s262_s20  }
  0x13   :  { %s263_s23 = smov [#allocation6]   ;;  %s210_s27 = scalar_lea.hbm %s333_s1, 256 }
  0x14   :  { %s27_s24 = sshll.u32 %s263_s23, 4  ;;  %p211_p8 = scmp.ne.s32.totalorder %s333_s1, %s210_s27  ;;  %s28_s24 = int_to_ptr.vmem [resolvable:$true] %s27_s24 }
  0x15   :  { %p214_p9 = scmp.lt.u32.totalorder %s210_s27, %s333_s1 }
  0x17   :  { %p216_p10 = pnand %p214_p9, %p211_p8 }
  0x19   :  { %219 = shalt.err (!%p216_p10)
}
  0x1a   :  { %s220_s4 = scalar_lea.vmem %s28_s24, 256  ;;  %p225_p12 = scmp.lt.s32.totalorder %s28_s24, %s28_s24 }
  0x1b   :  { %p221_p11 = scmp.ne.s32.totalorder %s28_s24, %s220_s4  ;;  %p226_p13 = scmp.lt.s32.totalorder %s220_s4, %s220_s4 }
  0x1d   :  { %p227_p0 = por %p226_p13, %p225_p12 }
  0x1f   :  { %p228_p1 = pnand %p227_p0, %p221_p11 }
  0x21   :  { %231 = shalt.err (!%p228_p1)
}
  0x22   :  { %33 = dma.hbm_to_vmem [thread:$0]  %s333_s1, 256, %s28_s24, [#allocation7], %s261_s19, %s261_s19, %s262_s20  }
  0x23   :  { %254 = dma.done.wait [#allocation4], 256  }
  0x24   :  { %255 = vsyncadd [#allocation4], 4294967040 }
  0x25   :  { %256 = dma.done.wait [#allocation7], 256  }
  0x26   :  { %257 = vsyncadd [#allocation7], 4294967040  ;;  %vm44_vm0 = vcmask 261120   ;;  %v264_v0 = vmov 0.0   ;;  %vm53_vm1 = vcmask 130048   ;;  %v51_v1 = vld [vmem:[#allocation6] sm:$0xff] }
  0x27   :  { %46 = vst.msk [vmem:[#allocation2 + $0x8] sm:$0xff] %vm44_vm0, %v264_v0  ;;  %45 = vst.msk [vmem:[#allocation2] sm:$0xff] %vm44_vm0, %v264_v0  ;;  %v52_v2 = vld [vmem:[#allocation6 + $0x8] sm:$0xff]  ;;  %v49_v3 = vld [vmem:[#allocation3] sm:$0xff]  ;;  %s265_s1 = smov [#allocation8]  }
  0x28   :  { %v178_v4 = vpack.c.bf16 %v52_v2, %v51_v1  ;;  %175 = vmatprep.mubr.msk.f32.mxu0 %vm53_vm1, %v49_v3  ;;  %v50_v5 = vld [vmem:[#allocation3 + $0x8] sm:$0xff]  ;;  %s152_s6 = sshll.u32 %s265_s1, 4  ;;  %s153_s6 = int_to_ptr.vmem [resolvable:$true] %s152_s6 }
  0x29   :  { %s232_s7 = scalar_lea.vmem %s153_s6, 256  ;;  %p237_p3 = scmp.lt.s32.totalorder %s153_s6, %s153_s6 }
  0x2a   :  { %179 = vmatprep.subr.bf16.mxu0 %v178_v4  ;;  %p233_p2 = scmp.ne.s32.totalorder %s153_s6, %s232_s7  ;;  %p238_p4 = scmp.lt.s32.totalorder %s232_s7, %s232_s7 }
  0x2b   :  { %181 = vmatpush3.bf16.msra.mxu0 %v178_v4 }
  0x2c   :  { %p239_p5 = por %p238_p4, %p237_p3 }
  0x2e   :  { %176 = vmatmul.mubr.msk.f32.vlgmr.msra.gmra.mrb[0].mxu0 %vm53_vm1, %v50_v5  ;;  %v48_v6 = vld [vmem:[#allocation2 + $0x8] sm:$0xff]  ;;  %v47_v7 = vld [vmem:[#allocation2] sm:$0xff]  ;;  %p240_p6 = pnand %p239_p5, %p233_p2 }
 0x101   :  { %v177_v8 = vpop.f32.mrb[0].mxu0 }
 0x102   :  { %v136_v9 = vadd.f32 %v177_v8, %v48_v6  ;;  %v126_v10 = vpop.f32.mrb[1].mxu0 }
 0x103   :  { %v135_v11 = vadd.f32 %v126_v10, %v47_v7 }
 0x104   :  { %139 = vst.msk [vmem:[#allocation2 + $0x8] sm:$0xff] %vm44_vm0, %v136_v9 }
 0x105   :  { %138 = vst.msk [vmem:[#allocation2] sm:$0xff] %vm44_vm0, %v135_v11 }
 0x10b   :  { %v144_v12 = vld [vmem:[#allocation2 + $0x8] sm:$0xff] }
 0x10c   :  { %v143_v13 = vld [vmem:[#allocation2] sm:$0xff]  ;;  %146 = vst.msk [vmem:[#allocation8 + $0x8] sm:$0xff] %vm44_vm0, %v144_v12 }
 0x10d   :  { %145 = vst.msk [vmem:[#allocation8] sm:$0xff] %vm44_vm0, %v143_v13 }
 0x10e   :  { %243 = shalt.err (!%p240_p6)
}
 0x10f   :  { %s244_s10 = scalar_lea.hbm %s334_s2, 256 }
 0x110   :  { %p245_p7 = scmp.ne.s32.totalorder %s334_s2, %s244_s10  ;;  %p248_p8 = scmp.lt.u32.totalorder %s244_s10, %s334_s2 }
 0x112   :  { %p250_p9 = pnand %p248_p8, %p245_p7 }
 0x114   :  { %253 = shalt.err (!%p250_p9)
}
 0x115   :  { %158 = dma.vmem_to_hbm [thread:$0]  %s153_s6, 256, %s334_s2, [#allocation5], %s261_s19, %s261_s19, %s262_s20  }
 0x116   :  { %258 = dma.done.wait [#allocation5], 256  }
 0x117   :  { %259 = vsyncadd [#allocation5], 4294967040 }
 0x118   :  { %162 = vsyncpa [#allocation4], 1 }
 0x119   :  { %163 = vsyncpa [#allocation7], 1 }
 0x11a   :  { %164 = vsyncpa [#allocation5], 1 }

</bundles_post_ra>
